<compile_context>
chip_gen: v5e
topology: v5e:2x2
jax: 0.10.0
libtpu: 0.0.40
codegen_flags: <defaults>
</compile_context>

<pallas_src>
import jax
import jax.numpy as jnp
from jax.experimental import pallas as pl
from jax.experimental.pallas import tpu as pltpu


def _gcn_kernel(adj_ref, x_ref, w_ref, o_ref):
    # adj_ref: (TN, N)          -- node-tile rows of (I + adj)
    # x_ref:   (N, TB*Din)      -- x transposed to node-major, batch*feature in lanes
    # w_ref:   (TN, Din, Dout)  -- per-node weight tile
    # o_ref:   (TN, TB*Dout)    -- lane-dense output slab for this tile
    tn = w_ref.shape[0]
    din = w_ref.shape[1]
    dout = w_ref.shape[2]
    tb = o_ref.shape[1] // dout

    # Step 1: neighborhood aggregation for ALL batches in the tile at once
    # (single wide MXU matmul):
    #   agg_flat[t, b*Din + d] = sum_j adj[t, j] * x[j, b*Din + d]
    agg_flat = jnp.dot(adj_ref[...], x_ref[...],
                       preferred_element_type=jnp.float32)            # (TN, TB*Din)

    # Step 2: per-node linear map with the batch as the MXU M dimension.
    # Cast back to the weight dtype (no-op for f32, keeps bf16 on the fast MXU
    # path) while accumulating in f32.
    agg = agg_flat.reshape(tn, tb, din).astype(w_ref.dtype)           # (TN, TB, Din)
    out = jax.lax.dot_general(
        agg, w_ref[...],
        dimension_numbers=(((2,), (1,)), ((0,), (0,))),               # batch over node
        preferred_element_type=jnp.float32)                           # (TN, TB, Dout)

    o_ref[...] = out.reshape(tn, tb * dout).astype(o_ref.dtype)


def batched_graph_convolution(adj_buf, x, weight, *, tile_n=None, tile_b=None):
    """adj_buf: (N, N), x: (B, N, Din), weight: (N, Din, Dout) -> (B, N, Dout)."""
    B, N, Din = x.shape
    Nw, Din_w, Dout = weight.shape
    assert adj_buf.shape == (N, N) and Nw == N and Din_w == Din

    # Node tile: keep adj tile + weight tile + agg well inside VMEM (small enough
    # for v7x's 64 MiB / v5e's 16 MiB scoped default at these block sizes).
    if tile_n is None:
        tile_n = N if N <= 256 else 256
    if tile_b is None:
        tile_b = B
    assert N % tile_n == 0 and B % tile_b == 0
    assert tile_n == N or tile_n % 8 == 0, "node tile must be sublane-aligned"
    if tile_b != B:
        # Partial batch tiles must keep the flattened lane dims 128-aligned.
        assert (tile_b * Din) % 128 == 0 and (tile_b * Dout) % 128 == 0, \
            "batch tiling requires lane-aligned flattened tiles"

    # Layout plumbing outside the kernel: node-major x, batch*feature in lanes.
    x_flat = jnp.transpose(x, (1, 0, 2)).reshape(N, B * Din)          # (N, B*Din)

    grid = (N // tile_n, B // tile_b)

    itemsize = jnp.dtype(x.dtype).itemsize
    cost = pl.CostEstimate(
        flops=2 * B * N * N * Din + 2 * B * N * Din * Dout,
        transcendentals=0,
        bytes_accessed=(adj_buf.size * jnp.dtype(adj_buf.dtype).itemsize
                        + x.size * itemsize
                        + weight.size * jnp.dtype(weight.dtype).itemsize
                        + B * N * Dout * itemsize),
    )

    out_flat = pl.pallas_call(
        _gcn_kernel,
        out_shape=jax.ShapeDtypeStruct((N, B * Dout), x.dtype),
        grid_spec=pltpu.PrefetchScalarGridSpec(
            num_scalar_prefetch=0,
            grid=grid,
            in_specs=[
                # adj rows for this node tile (re-used across batch tiles).
                pl.BlockSpec((tile_n, N), lambda nt, bt: (nt, 0)),
                # x (node-major, flattened batch*feature) for this batch tile.
                pl.BlockSpec((N, tile_b * Din), lambda nt, bt: (0, bt)),
                # per-node weight tile (tiled over the node axis).
                pl.BlockSpec((tile_n, Din, Dout), lambda nt, bt: (nt, 0, 0)),
            ],
            out_specs=pl.BlockSpec((tile_n, tile_b * Dout),
                                   lambda nt, bt: (nt, bt)),
        ),
        compiler_params=pltpu.CompilerParams(
            dimension_semantics=("parallel", "parallel"),
            vmem_limit_bytes=48 * 1024 * 1024,
        ),
        cost_estimate=cost,
    )(adj_buf, x_flat, weight)

    # (N, B*Dout) -> (B, N, Dout)
    return jnp.transpose(out_flat.reshape(N, B, Dout), (1, 0, 2))


if __name__ == "__main__":
    # Small shapes consistent with the module's forward; tile_n=8 exercises a
    # multi-step node-tile grid.
    B, N, Din, Dout = 2, 16, 32, 16

    key = jax.random.PRNGKey(0)
    k_adj, k_w, k_x = jax.random.split(key, 3)

    # Deterministic synthetic adjacency (binary, zero diagonal); buffer = I + adj.
    adj_raw = jax.random.bernoulli(k_adj, p=0.3, shape=(N, N)).astype(jnp.float32)
    adj_raw = adj_raw * (1.0 - jnp.eye(N, dtype=jnp.float32))
    adj_buf = jnp.eye(N, dtype=jnp.float32) + adj_raw

    # Deterministic "randn" weight, as in the module __init__.
    weight = jax.random.normal(k_w, (N, Din, Dout), dtype=jnp.float32)

    # Input x: (batch, n_edges, input_dim)
    x = jax.random.normal(k_x, (B, N, Din), dtype=jnp.float32)

    out = batched_graph_convolution(adj_buf, x, weight, tile_n=8)
    out = jax.block_until_ready(out)

    # Reference (plain JAX) check of the einsum chain.
    agg_ref = jnp.einsum('ij,bjd->bid', adj_buf, x)
    out_ref = jnp.einsum('bni,nio->bno', agg_ref, weight)
    assert out.shape == (B, N, Dout)
    assert jnp.allclose(out, out_ref, atol=1e-4, rtol=1e-4)

    print("KERNEL_OK")
</pallas_src>

<mosaic_0001>
module attributes {stable_mosaic.version = 11 : i64} {
  func.func @_gcn_kernel(%arg0: i32, %arg1: i32, %arg2: memref<8x16xf32, #tpu.memory_space<vmem>>, %arg3: memref<16x64xf32, #tpu.memory_space<vmem>>, %arg4: memref<8x32x16xf32, #tpu.memory_space<vmem>>, %arg5: memref<8x32xf32, #tpu.memory_space<vmem>>) attributes {dimension_semantics = [#tpu.dimension_semantics<parallel>, #tpu.dimension_semantics<parallel>], iteration_bounds = array<i64: 2, 1>, scalar_prefetch = 0 : i64, scratch_operands = 0 : i64, tpu.core_type = #tpu.core_type<tc>, window_params = [{transform_indices = @transform_0, window_bounds = array<i64: 8, 16>}, {transform_indices = @transform_1, window_bounds = array<i64: 16, 64>}, {transform_indices = @transform_2, window_bounds = array<i64: 8, 32, 16>}, {transform_indices = @transform_3, window_bounds = array<i64: 8, 32>}]} {
    %c0 = arith.constant 0 : index
    %c0_0 = arith.constant 0 : index
    %0 = vector.load %arg2[%c0, %c0_0] : memref<8x16xf32, #tpu.memory_space<vmem>>, vector<8x16xf32>
    %c0_1 = arith.constant 0 : index
    %c0_2 = arith.constant 0 : index
    %1 = vector.load %arg3[%c0_1, %c0_2] : memref<16x64xf32, #tpu.memory_space<vmem>>, vector<16x64xf32>
    %cst = arith.constant dense<0.000000e+00> : vector<8x64xf32>
    %2 = tpu.matmul %0, %1, %cst {dimension_numbers = #tpu.dot_dimension_numbers<[1], [0], [0], [1], [0, 0, 1, 1], [], []>} : vector<8x16xf32>, vector<16x64xf32>, vector<8x64xf32> -> vector<8x64xf32>
    %3 = vector.shape_cast %2 : vector<8x64xf32> to vector<8x2x32xf32>
    %c0_3 = arith.constant 0 : index
    %c0_4 = arith.constant 0 : index
    %c0_5 = arith.constant 0 : index
    %4 = vector.load %arg4[%c0_3, %c0_4, %c0_5] : memref<8x32x16xf32, #tpu.memory_space<vmem>>, vector<8x32x16xf32>
    %cst_6 = arith.constant dense<0.000000e+00> : vector<8x2x16xf32>
    %5 = tpu.matmul %3, %4, %cst_6 {dimension_numbers = #tpu.dot_dimension_numbers<[2], [1], [1], [2], [0, 0, 0, 1, 1, 2], [0], [0]>} : vector<8x2x32xf32>, vector<8x32x16xf32>, vector<8x2x16xf32> -> vector<8x2x16xf32>
    %6 = vector.shape_cast %5 : vector<8x2x16xf32> to vector<8x32xf32>
    %c0_7 = arith.constant 0 : index
    %c0_8 = arith.constant 0 : index
    %7 = vector.load %arg5[%c0_7, %c0_8] : memref<8x32xf32, #tpu.memory_space<vmem>>, vector<8x32xf32>
    tpu.vector_store %arg5[%c0_7, %c0_8], %6 {strides = array<i32>} : memref<8x32xf32, #tpu.memory_space<vmem>>, vector<8x32xf32>,
    return
  }
  func.func @transform_0(%arg0: i32, %arg1: i32) -> (i32, i32) {
    %c0_i32 = arith.constant 0 : i32
    %c0_i32_0 = arith.constant 0 : i32
    return %arg0, %c0_i32 : i32, i32
  }
  func.func @transform_1(%arg0: i32, %arg1: i32) -> (i32, i32) {
    %c0_i32 = arith.constant 0 : i32
    %c0_i32_0 = arith.constant 0 : i32
    return %c0_i32, %arg1 : i32, i32
  }
  func.func @transform_2(%arg0: i32, %arg1: i32) -> (i32, i32, i32) {
    %c0_i32 = arith.constant 0 : i32
    %c0_i32_0 = arith.constant 0 : i32
    %c0_i32_1 = arith.constant 0 : i32
    return %arg0, %c0_i32, %c0_i32_0 : i32, i32, i32
  }
  func.func @transform_3(%arg0: i32, %arg1: i32) -> (i32, i32) {
    %c0_i32 = arith.constant 0 : i32
    return %arg0, %arg1 : i32, i32
  }
}

</mosaic_0001>

<bundles_post_ra>
// kernel: tpu_custom_call.1
= control target key start
LH: loop header
LB: loop body
LE: loop exit
PB: predicated region body
PF: predicated region fallthrough
CT: control target
= control target key end

     0   :  { %8 = vsyncpa [#allocation3], 0  ;;  %s1058_s0 = inlined_call_operand.vmem [shape: f32[16,16], index: 0, kind: input, shape index: {}]   ;;  %s1059_s1 = inlined_call_operand.vmem [shape: f32[16,64], index: 1, kind: input, shape index: {}]   ;;  %s1060_s2 = inlined_call_operand.vmem [shape: f32[16,32,16], index: 2, kind: input, shape index: {}]   ;;  %s1061_s3 = inlined_call_operand.hbm [shape: f32[16,32], index: 3, kind: output, shape index: {}]  }
   0x1   :  { %10 = vsyncpa [#allocation3 + $0x1], 0  ;;  %s869_s12 = smov 0   ;;  %s871_s13 = smov 0  }
   0x2   :  { %s873_s14 = smov 0   ;;  %s875_s15 = smov 0  }
   0x3   :  { %s877_s16 = smov 0   ;;  %s879_s17 = smov 0  }
   0x4 LB: > { %s681_s18 = sadd.s32 4294967295, %s843_s17   ;;  %s682_s19 = sadd.s32 4294967294, %s843_s17   ;;  %s843_s17 = sphi %s879_s17, %s16_s17   ;;  %s839_s16 = sphi %s877_s16, %s1068_s16   ;;  %s835_s15 = sphi %s875_s15, %s1067_s15   ;;  %s831_s14 = sphi %s873_s14, %s1066_s14   ;;  %s827_s13 = sphi %s871_s13, %s1065_s13   ;;  %s823_s12 = sphi %s869_s12, %s1064_s12  }
   0x5   : > { %s28_s20 = sadd.s32 1, %s839_s16  ;;  %s115_s21 = sadd.s32 1, %s831_s14 }
   0x6   : > { %p30_p0 = scmp.ge.s32.totalorder %s28_s20, 2  ;;  %p125_p1 = scmp.ne.s32.totalorder %s831_s14, %s827_s13 }
   0x7   : > { %p126_p2 = scmp.eq.s32.totalorder %s681_s18, 1  ;;  %p131_p3 = scmp.ne.s32.totalorder %s827_s13, %s823_s12 }
   0x8   : > { %s1070_s20 = smov (%p30_p0, %s28_s20), 0  ;;  %p132_p5 = scmp.eq.s32.totalorder %s682_s19, 1 }
   0x9   : > { %p909_p4 = por %p126_p2, %p125_p1  ;;  %s110_s23 = ssub.s32 %s839_s16, %s1070_s20 }
   0xa   : > { %p686_p6 = scmp.ge.s32.totalorder %s843_s17, 1  ;;  %p113_p7 = scmp.eq.s32.totalorder %s110_s23, 0 }
   0xb   : > { %p916_p8 = por %p132_p5, %p131_p3  ;;  %p174_p9 = scmp.lt.s32.totalorder %s843_s17, 3 }
   0xc   : > { %s922_s25 = scalar_select %p113_p7, %s831_s14, %s115_s21  }
   0xd   : > { %p175_p10 = pnand %p686_p6, %p174_p9 }
   0xe   : > { %p207_p11 = scmp.lt.s32.totalorder (!%p175_p10), %s835_s15, 1  ;;  %s937_s8 = sshll.u32 (!%p175_p10), %s835_s15, 3 }
   0xf   : > { %178 = sbr.rel (%p175_p10) target bundleno = 544 (0x220), region = 32  ;;  %p216_p12 = scmp.lt.s32.totalorder (!%p175_p10), %s937_s8, 15 }
  0x10   : > { %s848_s21 = smov (!%p175_p10), 16   ;;  %s204_s23 = sand.u32 (!%p175_p10), 1, %s827_s13  }
  0x11   : > { %s687_s26 = sshll.u32 (!%p175_p10), %s204_s23, 3  ;;  %s581_s29 = scalar_lea.hbm (!%p175_p10), %s1061_s3, %s937_s8 }
  0x12   : > { %s585_s5 = sshll.u32 (!%p175_p10), %s581_s29, 4  ;;  %s570_s6 = scalar_lea.sflag (!%p175_p10), [#allocation3], %s204_s23  ;;  %s586_s5 = int_to_ptr.hbm [resolvable:$true] %s585_s5 }
  0x13   : > { %s785_s11 = scalar_lea.hbm (!%p175_p10), %s1061_s3, 16 }
  0x14   : > { %v224_v0 = vld [vmem:[%s1059_s1 + $0x8] sm:$0xff]  ;;  %v223_v1 = vld [vmem:[%s1059_s1] sm:$0xff]  ;;  %s208_s30 = scalar_select %p207_p11, %s835_s15, 1  ;;  %vm225_vm0 = vcmask 130048   ;;  %v846_v36 = vmov 1983009808  }
  0x15   : > { %243 = vmatpush.msra.mxu0 %v224_v0  ;;  %s217_s9 = scalar_select %p216_p12, %s937_s8, 15  ;;  %v257_v37 = vunpack.c.l.s4 %v846_v36  ;;  %vm254_vm1 = vcmask 1047556   ;;  %v847_v40 = vmov 1934713408   ;;  %vm338_vm2 = vcmask 261120  }
  0x16   : > { %s688_s4 = sshll.u32 %s208_s30, 3  ;;  %s845_s15 = smov 96   ;;  %v279_v41 = vunpack.c.l.s4 %v847_v40 }
  0x17   : > { %244 = vmatpush.msra.mxu0 %v223_v1  ;;  %s210_s7 = scalar_lea.vmem %s1058_s0, %s688_s4  ;;  %s705_s10 = sshll.u32 %s217_s9, 5  ;;  %v982_v39 = vunpack.c.0.s8 %v257_v37 }
  0x18   : > { %v222_v2 = vld [vmem:[%s210_s7] sm:$0xff]  ;;  %s944_s19 = scalar_lea.vmem %s1060_s2, %s705_s10  ;;  %v280_v46 = vunpack.c.0.s8 %v279_v41  ;;  %s206_s30 = scalar_lea.vmem [#allocation2], %s687_s26 }
  0x19   : > { %692 = vmatmul.msk.f32.vlgmr.msra.gmra.mxu0 %vm225_vm0, %v222_v2  ;;  %v317_v3 = vld [vmem:[%s944_s19 + $0x58] sm:$0xff]  ;;  %v316_v6 = vld [vmem:[%s944_s19 + $0x50] sm:$0xff]  ;;  %v315_v9 = vld [vmem:[%s944_s19 + $0x48] sm:$0xff]  ;;  %s583_s4 = sshll.u32 %s206_s30, 4  ;;  %s779_s7 = sshra.s32 %s586_s5, 4  ;;  %s584_s4 = int_to_ptr.vmem [resolvable:$true] %s583_s4  ;;  %s780_s7 = int_to_ptr.hbm [resolvable:$true] %s779_s7 }
  0x1a   : > { %400 = vmatpush.msra.mxu3 %v317_v3  ;;  %v309_v5 = vld [vmem:[%s944_s19 + $0x18] sm:$0xff]  ;;  %v308_v8 = vld [vmem:[%s944_s19 + $0x10] sm:$0xff]  ;;  %v307_v12 = vld [vmem:[%s944_s19 + $0x8] sm:$0xff]  ;;  %s781_s9 = scalar_lea.hbm %s780_s7, 8  ;;  %p786_p2 = scmp.lt.s32.totalorder %s780_s7, %s1061_s3 }
  0x1b   : > { %354 = vmatpush.msra.mxu1 %v309_v5  ;;  %v321_v7 = vld [vmem:[%s944_s19 + $0x78] sm:$0xff]  ;;  %v320_v11 = vld [vmem:[%s944_s19 + $0x70] sm:$0xff]  ;;  %v314_v13 = vld [vmem:[%s944_s19 + $0x40] sm:$0xff]  ;;  %p782_p13 = scmp.ne.s32.totalorder %s780_s7, %s781_s9  ;;  %p787_p3 = scmp.lt.s32.totalorder %s785_s11, %s781_s9 }
  0x1c   : > { %401 = vmatpush.msra.mxu3 %v316_v6  ;;  %423 = vmatpush.msrb.mxu0 %v321_v7  ;;  %v313_v10 = vld [vmem:[%s944_s19 + $0x38] sm:$0xff]  ;;  %v312_v14 = vld [vmem:[%s944_s19 + $0x30] sm:$0xff]  ;;  %v319_v15 = vld [vmem:[%s944_s19 + $0x68] sm:$0xff] }
  0x1d   : > { %355 = vmatpush.msra.mxu1 %v308_v8  ;;  %377 = vmatpush.msra.mxu2 %v313_v10  ;;  %v306_v16 = vld [vmem:[%s944_s19] sm:$0xff]  ;;  %v333_v17 = vld [vmem:[%s944_s19 + $0xd8] sm:$0xff]  ;;  %v311_v18 = vld [vmem:[%s944_s19 + $0x28] sm:$0xff]  ;;  %p783_p0 = pnand %p782_p13, %p909_p4  ;;  %p788_p5 = por %p787_p3, %p786_p2 }
  0x1e   : > { %402 = vmatpush.msra.mxu3 %v315_v9  ;;  %424 = vmatpush.msrb.mxu0 %v320_v11  ;;  %v318_v19 = vld [vmem:[%s944_s19 + $0x60] sm:$0xff]  ;;  %v325_v20 = vld [vmem:[%s944_s19 + $0x98] sm:$0xff]  ;;  %v332_v21 = vld [vmem:[%s944_s19 + $0xd0] sm:$0xff] }
  0x1f   : > { %356 = vmatpush.msra.mxu1 %v307_v12  ;;  %378 = vmatpush.msra.mxu2 %v312_v14  ;;  %v310_v22 = vld [vmem:[%s944_s19 + $0x20] sm:$0xff]  ;;  %v337_v23 = vld [vmem:[%s944_s19 + $0xf8] sm:$0xff]  ;;  %v324_v24 = vld [vmem:[%s944_s19 + $0x90] sm:$0xff]  ;;  %p784_p1 = pneg %p783_p0 }
  0x20   : > { %403 = vmatpush.msra.mxu3 %v314_v13  ;;  %425 = vmatpush.msrb.mxu0 %v319_v15  ;;  %v331_v25 = vld [vmem:[%s944_s19 + $0xc8] sm:$0xff]  ;;  %v329_v26 = vld [vmem:[%s944_s19 + $0xb8] sm:$0xff]  ;;  %v336_v27 = vld [vmem:[%s944_s19 + $0xf0] sm:$0xff] }
  0x21   : > { %357 = vmatpush.msra.mxu1 %v306_v16  ;;  %379 = vmatpush.msra.mxu2 %v311_v18  ;;  %v323_v28 = vld [vmem:[%s944_s19 + $0x88] sm:$0xff]  ;;  %v328_v29 = vld [vmem:[%s944_s19 + $0xb0] sm:$0xff]  ;;  %v330_v30 = vld [vmem:[%s944_s19 + $0xc0] sm:$0xff]  ;;  %p789_p6 = pnand %p788_p5, %p784_p1 }
  0x22   : > { %492 = vmatpush.msrb.mxu3 %v333_v17  ;;  %426 = vmatpush.msrb.mxu0 %v318_v19  ;;  %v335_v31 = vld [vmem:[%s944_s19 + $0xe8] sm:$0xff]  ;;  %v322_v32 = vld [vmem:[%s944_s19 + $0x80] sm:$0xff] }
  0x23   : > { %446 = vmatpush.msrb.mxu1 %v325_v20  ;;  %380 = vmatpush.msra.mxu2 %v310_v22  ;;  %v327_v33 = vld [vmem:[%s944_s19 + $0xa8] sm:$0xff]  ;;  %v334_v34 = vld [vmem:[%s944_s19 + $0xe0] sm:$0xff] }
  0x24   : > { %493 = vmatpush.msrb.mxu3 %v332_v21  ;;  %515 = vmatpush.msra.mxu0 %v337_v23  ;;  %v326_v35 = vld [vmem:[%s944_s19 + $0xa0] sm:$0xff] }
  0x25   : > { %447 = vmatpush.msrb.mxu1 %v324_v24  ;;  %469 = vmatpush.msrb.mxu2 %v329_v26 }
  0x26   : > { %494 = vmatpush.msrb.mxu3 %v331_v25  ;;  %516 = vmatpush.msra.mxu0 %v336_v27 }
  0x27   : > { %448 = vmatpush.msrb.mxu1 %v323_v28  ;;  %470 = vmatpush.msrb.mxu2 %v328_v29 }
  0x28   : > { %495 = vmatpush.msrb.mxu3 %v330_v30  ;;  %517 = vmatpush.msra.mxu0 %v335_v31 }
  0x29   : > { %449 = vmatpush.msrb.mxu1 %v322_v32  ;;  %471 = vmatpush.msrb.mxu2 %v327_v33 }
  0x2a   : > { %518 = vmatpush.msra.mxu0 %v334_v34 }
  0x2b   : > { %472 = vmatpush.msrb.mxu2 %v326_v35 }
  0x96   : > { %v947_v4 = vpop.f32.mrf.mxu0 }
  0x97   : > { %250 = vrot.lane.b32.xlu0 %v947_v4, %s845_s15  ;;  %v253_v38 = vrot.slane %v947_v4, 4  ;;  %v259_v43 = vperm.slane %v947_v4, %v982_v39 }
  0x99   : > { %v255_v42 = vsel %vm254_vm1, 0.0, %v253_v38  ;;  %v276_v47 = vrot.slane %v259_v43, 4 }
  0x9a   : > { %v263_v44 = vperm.slane %v255_v42, %v982_v39 }
  0x9c   : > { %v288_v53 = vrot.slane %v263_v44, 4 }
 0x109   : > { %v251_v45 = vpop.permute.xlu0 %250 }
 0x10a   : > { %v264_v48 = vrot.slane %v251_v45, 4  ;;  %v269_v49 = vperm.slane %v251_v45, %v982_v39 }
 0x10c   : > { %v265_v50 = vsel %vm254_vm1, 0.0, %v264_v48  ;;  %v274_v51 = vrot.slane %v269_v49, 4  ;;  %v277_v52 = vsel %vm254_vm1, %v269_v49, %v276_v47 }
 0x10d   : > { %v273_v54 = vperm.slane %v265_v50, %v982_v39  ;;  %v285_v55 = vperm.slane %v277_v52, %v280_v46 }
 0x10e   : > { %v275_v56 = vsel %vm254_vm1, %v274_v51, %v259_v43 }
 0x10f   : > { %v286_v57 = vrot.slane %v273_v54, 4  ;;  %695 = vmatmul.msk.f32.vlgmr.msra.gmra.mxu3 %vm338_vm2, %v285_v55  ;;  %v281_v58 = vperm.slane %v275_v56, %v280_v46  ;;  %v300_v59 = vrot.slane %v285_v55, 4  ;;  %v289_v60 = vsel %vm254_vm1, %v273_v54, %v288_v53 }
 0x110   : > { %v297_v63 = vperm.slane %v289_v60, %v280_v46 }
 0x111   : > { %693 = vmatmul.msk.f32.vlgmr.msra.gmra.mxu1 %vm338_vm2, %v281_v58  ;;  %v301_v61 = vsel %vm254_vm1, 0.0, %v300_v59  ;;  %v298_v62 = vrot.slane %v281_v58, 4  ;;  %v287_v0 = vsel %vm254_vm1, %v286_v57, %v263_v44 }
 0x112   : > { %696 = vmatmul.msk.f32.vlgmr.msrb.gmra.mxu0 %vm338_vm2, %v301_v61  ;;  %v293_v2 = vperm.slane %v287_v0, %v280_v46  ;;  %v304_v3 = vrot.slane %v297_v63, 4 }
 0x113   : > { %v299_v1 = vsel %vm254_vm1, 0.0, %v298_v62 }
 0x114   : > { %694 = vmatmul.msk.f32.vlgmr.msra.gmra.mxu2 %vm338_vm2, %v299_v1  ;;  %v302_v4 = vrot.slane %v293_v2, 4  ;;  %v305_v5 = vsel %vm254_vm1, 0.0, %v304_v3 }
 0x116   : > { %v303_v6 = vsel %vm254_vm1, 0.0, %v302_v4 }
 0x117   : > { %699 = vmatmul.msk.f32.vlgmr.msrb.gmra.mxu3 %vm338_vm2, %v297_v63 }
 0x119   : > { %697 = vmatmul.msk.f32.vlgmr.msrb.gmra.mxu1 %vm338_vm2, %v293_v2 }
 0x11a   : > { %700 = vmatmul.msk.f32.vlgmr.msra.gmra.mxu0 %vm338_vm2, %v305_v5 }
 0x11c   : > { %698 = vmatmul.msk.f32.vlgmr.msrb.gmra.mxu2 %vm338_vm2, %v303_v6 }
 0x18e   : > { %v359_v9 = vpop.f32.mrf.mxu1 }
 0x18f   : > { %v428_v7 = vpop.f32.mrf.mxu0 }
 0x190   : > { %v529_v10 = vrot.slane %v428_v7, 4 }
 0x192   : > { %v405_v8 = vpop.f32.mrf.mxu3 }
 0x193   : > { %v523_v11 = vrot.slane %v405_v8, 4 }
 0x195   : > { %v524_v15 = vsel %vm254_vm1, %v523_v11, %v359_v9 }
 0x196   : > { %v528_v20 = vperm.slane %v524_v15, %v982_v39  ;;  %v451_v22 = vpop.f32.mrf.mxu1 }
 0x197   : > { %v382_v12 = vpop.f32.mrf.mxu2  ;;  %v520_v18 = vpop.f32.mrf.mxu0 }
 0x198   : > { %v530_v13 = vsel %vm254_vm1, %v529_v10, %v382_v12  ;;  %v541_v21 = vrot.slane %v520_v18, 4 }
 0x199   : > { %v534_v14 = vperm.slane %v530_v13, %v982_v39 }
 0x19a   : > { %v497_v16 = vpop.f32.mrf.mxu3 }
 0x19b   : > { %v547_v17 = vrot.slane %v534_v14, 4  ;;  %v535_v19 = vrot.slane %v497_v16, 4 }
 0x19d   : > { %v548_v23 = vsel %vm254_vm1, %v547_v17, %v528_v20  ;;  %v536_v25 = vsel %vm254_vm1, %v535_v19, %v451_v22 }
 0x19e   : > { %v552_v28 = vperm.slane %v548_v23, %v280_v46  ;;  %v540_v29 = vperm.slane %v536_v25, %v982_v39 }
 0x19f   : > { %v474_v24 = vpop.f32.mrf.mxu2 }
 0x1a0   : > { %v542_v26 = vsel %vm254_vm1, %v541_v21, %v474_v24  ;;  %v561_v33 = vrot.slane %v552_v28, 4 }
 0x1a1   : > { %v546_v27 = vperm.slane %v542_v26, %v982_v39 }
 0x1a3   : > { %v553_v30 = vrot.slane %v546_v27, 4 }
 0x1a5   : > { %v554_v31 = vsel %vm254_vm1, %v553_v30, %v540_v29 }
 0x1a6   : > { %v558_v32 = vperm.slane %v554_v31, %v280_v46 }
 0x1a8   : > { %v562_v34 = vsel %vm254_vm1, %v558_v32, %v561_v33  ;;  %v559_v35 = vrot.slane %v558_v32, 4 }
 0x1a9   : > { %564 = vrot.lane.b32.xlu0 %v562_v34, %s848_s21 }
 0x1aa   : > { %v560_v36 = vsel %vm254_vm1, %v559_v35, %v552_v28 }
 0x21b   : > { %v565_v37 = vpop.permute.xlu0 %564 }
 0x21c   : > { %v567_v38 = vsel %vm225_vm0, %v560_v36, %v565_v37 }
 0x21d   : > { %568 = vst.msk [vmem:[%s206_s30] sm:$0xff] %vm338_vm2, %v567_v38 }
 0x21e   : > { %792 = shalt.err (!%p789_p6)
}
 0x21f   : > { %706 = dma.vmem_to_hbm [thread:$0]  (%p909_p4), %s584_s4, 128, %s586_s5, %s570_s6  }
 0x220 PF: > { %p712_p7 = scmp.ge.s32.totalorder %s843_s17, 2  ;;  %s597_s15 = sand.u32 1, %s823_s12  }
 0x221   : > { %s598_s21 = scalar_lea.sflag [#allocation3], %s597_s15 }
 0x222   : > { %p709_p9 = pnand %p712_p7, %p916_p8 }
 0x224   : > { %p710_p10 = pneg %p709_p9 }
 0x226   : > { %818 = dma.done.wait (%p710_p10), %s598_s21, 128  }
 0x227   : > { %820 = vsyncadd (%p710_p10), %s598_s21, 4294967168  ;;  %s16_s17 = sadd.s32 1, %s843_s17   ;;  %s1064_s12 = smov %s827_s13 }
 0x228   : > { %p13_p11 = scmp.ge.s32.totalorder %s16_s17, 4   ;;  %s1065_s13 = smov %s831_s14 }
 0x229   : > { %s1066_s14 = smov %s922_s25  ;;  %s1067_s15 = smov %s839_s16 }
 0x22a   : > { %s1068_s16 = smov %s1070_s20  ;;  %15 = sbr.rel (!%p13_p11) target bundleno = 4 (0x4), region = 73 }
 0x22f   :  { %604 = vsyncpa [#allocation3], 1 }
 0x230   :  { %606 = vsyncpa [#allocation3 + $0x1], 1 }

</bundles_post_ra>
